<compile_context>
chip_gen: v5e
topology: v5e:2x2
jax: 0.10.0
libtpu: 0.0.40
codegen_flags: <defaults>
</compile_context>

<pallas_src>
import jax
import jax.numpy as jnp
from jax.experimental import pallas as pl
from jax.experimental.pallas import tpu as pltpu


# Slab layout inside one (8, 128) f32 tile (== one vreg, one DMA):
#   param1 : rows 0:3, cols 0:3    (3, 3)
#   input  : rows 4:7, cols 0:3    (3, 3)
#   wT     : rows 0:3, cols 8:12   (3, 4)  Linear weight, pre-transposed
#   bias   : row  7 , cols 0:4     (1, 4)
_SUB, _LANE = 8, 128


def net_kernel(slab_ref, o_ref):
    p = slab_ref[0:3, 0:3]        # param1                  (3, 3)
    x = slab_ref[4:7, 0:3]        # input                   (3, 3)
    wT = slab_ref[0:3, 8:12]      # Linear weight (already transposed) (3, 4)
    b = slab_ref[7:8, 0:4]        # Linear bias             (1, 4)

    # h = param1 @ input                         -> (3, 3)
    h = jnp.dot(p, x, preferred_element_type=jnp.float32)
    # y = h @ W.T + b  (nn.Linear), fused into one expression / one store
    o_ref[...] = jnp.dot(h, wT, preferred_element_type=jnp.float32) + b


def net_forward(param1, x, w, b):
    M, K = param1.shape            # (3, 3)
    K2, N = x.shape                # (3, 3)
    Fout, Fin = w.shape            # (4, 3)
    assert (M, K, K2, N, Fout, Fin) == (3, 3, 3, 3, 4, 3), "Net fixes these sizes"

    # Pack everything into a single lane-dense (8, 128) slab (wrapper-side,
    # pure layout plumbing; the W transpose is hoisted here too).
    slab = jnp.zeros((_SUB, _LANE), jnp.float32)
    slab = slab.at[0:3, 0:3].set(param1.astype(jnp.float32))
    slab = slab.at[4:7, 0:3].set(x.astype(jnp.float32))
    slab = slab.at[0:3, 8:12].set(w.T.astype(jnp.float32))
    slab = slab.at[7:8, 0:4].set(b.reshape(1, Fout).astype(jnp.float32))

    return pl.pallas_call(
        net_kernel,
        out_shape=jax.ShapeDtypeStruct((M, Fout), jnp.float32),
        in_specs=[pl.BlockSpec(memory_space=pltpu.MemorySpace.VMEM)],
        out_specs=pl.BlockSpec(memory_space=pltpu.MemorySpace.VMEM),
    )(slab)


if __name__ == "__main__":
    key = jax.random.PRNGKey(0)
    k_p, k_w, k_b, _ = jax.random.split(key, 4)

    # param1 = nn.Parameter(torch.rand(3, 3))  -> uniform [0, 1)
    param1 = jax.random.uniform(k_p, (3, 3), dtype=jnp.float32)

    # nn.Linear(3, 4): weight (4, 3), bias (4,), uniform(-1/sqrt(3), 1/sqrt(3))
    bound = 1.0 / (3.0 ** 0.5)
    w = jax.random.uniform(k_w, (4, 3), dtype=jnp.float32, minval=-bound, maxval=bound)
    b = jax.random.uniform(k_b, (4,), dtype=jnp.float32, minval=-bound, maxval=bound)

    # Example input: (3, 3) so that Linear(3, 4) is shape-consistent after the
    # mm. (The book script's torch.arange(12).view(3,4) input would not pass
    # the Linear(3,4); a 3x3 input is what the forward actually implies.)
    x = jnp.arange(9, dtype=jnp.float32).reshape(3, 3)

    out = net_forward(param1, x, w, b)
    jax.block_until_ready(out)

    # Sanity-check against a plain JAX reference of the same math.
    ref = (param1 @ x) @ w.T + b
    assert out.shape == (3, 4)
    assert jnp.allclose(out, ref, atol=1e-5, rtol=1e-5)

    print("KERNEL_OK")
</pallas_src>

<mosaic_0001>
module attributes {stable_mosaic.version = 11 : i64} {
  func.func @net_kernel(%arg0: memref<8x128xf32, #tpu.memory_space<vmem>>, %arg1: memref<3x4xf32, #tpu.memory_space<vmem>>) attributes {dimension_semantics = [], scalar_prefetch = 0 : i64, scratch_operands = 0 : i64, tpu.core_type = #tpu.core_type<tc>} {
    %c0 = arith.constant 0 : index
    %c0_0 = arith.constant 0 : index
    %0 = vector.load %arg0[%c0, %c0_0] : memref<8x128xf32, #tpu.memory_space<vmem>>, vector<3x3xf32>
    %c4 = arith.constant 4 : index
    %c0_1 = arith.constant 0 : index
    %1 = vector.load %arg0[%c4, %c0_1] : memref<8x128xf32, #tpu.memory_space<vmem>>, vector<3x3xf32>
    %c0_2 = arith.constant 0 : index
    %c8 = arith.constant 8 : index
    %2 = vector.load %arg0[%c0_2, %c8] : memref<8x128xf32, #tpu.memory_space<vmem>>, vector<3x4xf32>
    %c7 = arith.constant 7 : index
    %c0_3 = arith.constant 0 : index
    %3 = vector.load %arg0[%c7, %c0_3] : memref<8x128xf32, #tpu.memory_space<vmem>>, vector<1x4xf32>
    %cst = arith.constant dense<0.000000e+00> : vector<3x3xf32>
    %4 = tpu.matmul %0, %1, %cst {dimension_numbers = #tpu.dot_dimension_numbers<[1], [0], [0], [1], [0, 0, 1, 1], [], []>} : vector<3x3xf32>, vector<3x3xf32>, vector<3x3xf32> -> vector<3x3xf32>
    %cst_4 = arith.constant dense<0.000000e+00> : vector<3x4xf32>
    %5 = tpu.matmul %4, %2, %cst_4 {dimension_numbers = #tpu.dot_dimension_numbers<[1], [0], [0], [1], [0, 0, 1, 1], [], []>} : vector<3x3xf32>, vector<3x4xf32>, vector<3x4xf32> -> vector<3x4xf32>
    %6 = vector.broadcast %3 : vector<1x4xf32> to vector<3x4xf32>
    %7 = arith.addf %5, %6 : vector<3x4xf32>
    %c0_5 = arith.constant 0 : index
    %c0_6 = arith.constant 0 : index
    %8 = vector.load %arg1[%c0_5, %c0_6] : memref<3x4xf32, #tpu.memory_space<vmem>>, vector<3x4xf32>
    tpu.vector_store %arg1[%c0_5, %c0_6], %7 {strides = array<i32>} : memref<3x4xf32, #tpu.memory_space<vmem>>, vector<3x4xf32>,
    return
  }
}

</mosaic_0001>

<bundles_post_ra>
// kernel: tpu_custom_call.1
= control target key start
LH: loop header
LB: loop body
LE: loop exit
PB: predicated region body
PF: predicated region fallthrough
CT: control target
= control target key end

     0   :  { %6 = vsyncpa [#allocation3], 0  ;;  %s180_s0 = inlined_call_operand.hbm [shape: f32[8,128], index: 0, kind: input, shape index: {}]   ;;  %s181_s1 = inlined_call_operand.hbm [shape: f32[3,4], index: 1, kind: output, shape index: {}]  }
   0x1   :  { %7 = vsyncpa [#allocation4], 0  ;;  %s13_s8 = sshll.u32 %s180_s0, 4  ;;  %s161_s9 = smov [#allocation2]   ;;  %s14_s8 = int_to_ptr.hbm [resolvable:$true] %s13_s8 }
   0x2   :  { %s15_s10 = sshll.u32 %s161_s9, 4  ;;  %s16_s10 = int_to_ptr.vmem [resolvable:$true] %s15_s10 }
   0x3   :  { %18 = dma.hbm_to_vmem [thread:$0]  %s14_s8, 128, %s16_s10, [#allocation3]  }
   0x4   :  { %157 = dma.done.wait [#allocation3], 128  }
   0x5   :  { %158 = vsyncadd [#allocation3], 4294967168  ;;  %vm30_vm0 = vcmask 1042432   ;;  %vm26_vm1 = vcmask 23552   ;;  %v24_v0 = vld [vmem:[#allocation2 + $0x4] sm:$0x7] }
   0x6   :  { %v23_v1 = vld [vmem:[#allocation2] sm:$0x7]  ;;  %101 = vmatpush.msk.msra.mxu0 %vm30_vm0, %v24_v0  ;;  %s162_s11 = smov 120   ;;  %v108_v4 = vld [vmem:[#allocation2 + $0x7] ss:$0 sm:$0xff]  ;;  %s163_s0 = smov [#allocation5]  }
   0x7   :  { %55 = vrot.lane.b32.xlu0 %v23_v1, %s162_s11  ;;  %102 = vmatmul.msk.f32.vlgmr.msra.gmra.mxu0 %vm26_vm1, %v23_v1  ;;  %s89_s12 = sshll.u32 %s163_s0, 4  ;;  %s91_s15 = sshll.u32 %s181_s1, 4  ;;  %vm82_vm2 = vcmask 26624   ;;  %s90_s12 = int_to_ptr.vmem [resolvable:$true] %s89_s12  ;;  %s92_s15 = int_to_ptr.hbm [resolvable:$true] %s91_s15 }
  0x79   :  { %v56_v2 = vpop.permute.xlu0 %55 }
  0x7a   :  { %103 = vmatpush.msk.msra.mxu1 %vm30_vm0, %v56_v2 }
  0x84   :  { %v51_v3 = vpop.f32.mrf.mxu0 }
  0x85   :  { %104 = vmatmul.msk.f32.vlgmr.msra.gmra.mxu1 %vm26_vm1, %v51_v3 }
 0x102   :  { %v79_v5 = vpop.f32.mrf.mxu1 }
 0x103   :  { %v80_v6 = vadd.f32 %v108_v4, %v79_v5 }
 0x105   :  { %83 = vst.msk [vmem:[#allocation5] sm:$0x7] %vm82_vm2, %v80_v6 }
 0x106   :  { %94 = dma.vmem_to_hbm [thread:$0]  %s90_s12, 64, %s92_s15, [#allocation4]  }
 0x107   :  { %159 = dma.done.wait [#allocation4], 64  }
 0x108   :  { %160 = vsyncadd [#allocation4], 4294967232 }
 0x109   :  { %99 = vsyncpa [#allocation3], 1 }
 0x10a   :  { %100 = vsyncpa [#allocation4], 1 }

</bundles_post_ra>
